<compile_context>
chip_gen: v6e
topology: v6e:2x2x1
jax: 0.10.0
libtpu: 0.0.40
codegen_flags: <defaults>
</compile_context>

<pallas_src>
import functools

import jax
import jax.numpy as jnp
from jax import lax
from jax.experimental import pallas as pl
from jax.experimental.pallas import tpu as pltpu


def _round_up(a, m):
    return ((a + m - 1) // m) * m


def _accumulate(x_ref, acc_ref, *, tail_rem):
    """Add this spatial tile's partial sum (f32) into acc_ref."""
    s = pl.program_id(1)

    @pl.when(s == 0)
    def _init():
        acc_ref[...] = jnp.zeros_like(acc_ref)

    x = x_ref[...]  # (TB, C, TS), native dtype (bf16 stays bf16 in VMEM/vregs)

    # NOTE on the lane-axis reduction (review item): with TS kept >= ~512,
    # Mosaic combines the TS/128 vregs with VALU adds before one cross-lane
    # (XLU) reduce per 8xC rows, so the 2-wide XLU slot stays far below the
    # HBM delivery rate and the kernel remains purely bandwidth-bound.
    if tail_rem is None:
        acc_ref[...] += jnp.sum(x, axis=-1, dtype=jnp.float32)
    else:
        last = pl.num_programs(1) - 1

        @pl.when(s != last)
        def _full():
            acc_ref[...] += jnp.sum(x, axis=-1, dtype=jnp.float32)

        @pl.when(s == last)
        def _tail():
            # Mask the ragged spatial tail in-VMEM instead of padding x in HBM.
            lane = lax.broadcasted_iota(jnp.int32, x.shape, 2)
            xm = jnp.where(lane < tail_rem, x, jnp.zeros_like(x))
            acc_ref[...] += jnp.sum(xm, axis=-1, dtype=jnp.float32)


def _pool_fc_kernel(x_ref, w_ref, logits_ref, pooled_ref, acc_ref, *, inv_hw, tail_rem):
    _accumulate(x_ref, acc_ref, tail_rem=tail_rem)

    @pl.when(pl.program_id(1) == pl.num_programs(1) - 1)
    def _finalize():
        pooled = acc_ref[...] * inv_hw                       # mean over TRUE H*W
        pooled_ref[...] = pooled.astype(pooled_ref.dtype)
        # Bias-free fc: pooled(B,C) . wT(C,N), contracting C. Weight was
        # pre-transposed in HBM -> no on-chip transpose, native-dtype MXU path,
        # f32 accumulation.
        logits = lax.dot_general(
            pooled.astype(w_ref.dtype), w_ref[...],
            dimension_numbers=(((1,), (0,)), ((), ())),
            preferred_element_type=jnp.float32,
        )
        logits_ref[...] = logits.astype(logits_ref.dtype)


def _pool_kernel(x_ref, pooled_ref, acc_ref, *, inv_hw, tail_rem):
    _accumulate(x_ref, acc_ref, tail_rem=tail_rem)

    @pl.when(pl.program_id(1) == pl.num_programs(1) - 1)
    def _finalize():
        pooled_ref[...] = (acc_ref[...] * inv_hw).astype(pooled_ref.dtype)


# Weights larger than this are NOT kept VMEM-resident: the fc runs in XLA so
# the x block (the only thing that matters for this HBM-bound kernel) stays big.
_FUSED_WEIGHT_BYTES_MAX = 4 * 1024 * 1024


def single_forward(x_nchw, weight):
    """Pallas version of Single.forward.

    Args:
      x_nchw: (B, C, H, W) activations (NCHW, like the PyTorch module).
      weight: (num_classes, in_dim) fc weight (PyTorch Linear layout).

    Returns:
      (logits, pooled): ((B, num_classes), (B, C)) -- same tuple as the module.
    """
    B, C, H, W = x_nchw.shape
    num_classes, in_dim = weight.shape
    assert in_dim == C, "fc in_dim must equal channel count after pooling"

    HW = H * W
    dtype = x_nchw.dtype
    itemsize = jnp.dtype(dtype).itemsize
    w_itemsize = jnp.dtype(weight.dtype).itemsize

    x3 = x_nchw.reshape(B, C, HW)          # free reshape, no data movement

    # ---- generation-aware VMEM budgets -----------------------------------
    try:
        vmem_cap = int(pltpu.get_tpu_info().vmem_capacity_bytes)
    except Exception:
        vmem_cap = 64 * 1024 * 1024        # conservative default (v7x per-core)
    if vmem_cap >= 100 * 1024 * 1024:      # v5e / v6e: 128 MiB physical VMEM
        x_budget = 12 * 1024 * 1024
        limit_cap = 96 * 1024 * 1024
    else:                                  # v7x: 64 MiB physical VMEM
        x_budget = 8 * 1024 * 1024
        limit_cap = 44 * 1024 * 1024

    # ---- batch tile -------------------------------------------------------
    if B <= 8:
        # TODO(synk): for B <= 8 only one batch tile exists; splitting channels
        # over a second "parallel" grid axis would feed v7x's 2nd TensorCore.
        TB = B
    else:
        nb_target = max(2, pl.cdiv(B, 64))  # >= 2 tiles so both v7x TCs get work
        TB = min(64, _round_up(pl.cdiv(B, nb_target), 8))

    # ---- spatial tile (lane axis) -----------------------------------------
    def fit_ts(tb):
        cap = x_budget // max(1, tb * C * itemsize)
        if cap >= HW:
            return HW                      # whole spatial extent in one tile
        if HW <= 128:
            return HW                      # cannot split below one vreg of lanes
        return (min(cap, HW) // 128) * 128

    TS = fit_ts(TB)
    ts_floor = min(512, HW)                # keep contiguous DMA runs >= ~512 elems
    while TS < ts_floor and TB > 8 and TB % 8 == 0:
        TB -= 8                            # shrink the batch tile first, never TS
        TS = fit_ts(TB)
    if TS == 0:                            # even the smallest TB misses the budget
        TS = 128 if HW >= 128 else HW

    nb = pl.cdiv(B, TB)
    ns = pl.cdiv(HW, TS)
    tail_rem = None if HW % TS == 0 else HW - (ns - 1) * TS
    inv_hw = 1.0 / float(HW)               # divide by the TRUE spatial extent

    fused = num_classes * C * w_itemsize <= _FUSED_WEIGHT_BYTES_MAX
    w_t = weight.T                          # (C, N): one-time, tiny vs activation traffic

    # ---- VMEM accounting for vmem_limit_bytes -----------------------------
    def _tile_bytes(rows, cols, isz):
        return _round_up(rows, 8) * _round_up(cols, 128) * isz

    x_blk = TB * _round_up(C, 8) * _round_up(TS, 128) * itemsize
    pooled_blk = _tile_bytes(TB, C, itemsize)
    acc_blk = _tile_bytes(TB, C, 4)
    w_blk = _tile_bytes(C, num_classes, w_itemsize) if fused else 0
    logits_blk = _tile_bytes(TB, num_classes, itemsize) if fused else 0

    def _vmem_limit(w_bufs):
        usage = 2 * x_blk + w_bufs * w_blk + 2 * (pooled_blk + logits_blk) + acc_blk
        limit = max(16 * 1024 * 1024, int(usage * 1.2) + 2 * 1024 * 1024)
        return max(min(limit, limit_cap), usage + 2 * 1024 * 1024)

    flops = B * C * HW + (2 * B * C * num_classes if fused else 0)
    bytes_accessed = (B * C * HW + B * C) * itemsize
    if fused:
        bytes_accessed += num_classes * C * w_itemsize + B * num_classes * itemsize
    cost = pl.CostEstimate(flops=flops, transcendentals=0,
                           bytes_accessed=bytes_accessed)

    # ---- pallas_call builders ---------------------------------------------
    def _run_fused(single_buffer_weight):
        # Constant-index weight: single-buffer it to reclaim VMEM for the x block.
        w_kwargs = {"pipeline_mode": pl.Buffered(1)} if single_buffer_weight else {}
        kernel = functools.partial(_pool_fc_kernel, inv_hw=inv_hw, tail_rem=tail_rem)
        return pl.pallas_call(
            kernel,
            out_shape=(
                jax.ShapeDtypeStruct((B, num_classes), dtype),
                jax.ShapeDtypeStruct((B, C), dtype),
            ),
            grid_spec=pltpu.PrefetchScalarGridSpec(
                num_scalar_prefetch=0,
                grid=(nb, ns),                       # reduction (spatial) axis last
                in_specs=[
                    pl.BlockSpec((TB, C, TS), lambda b, s: (b, 0, s)),
                    pl.BlockSpec((C, num_classes), lambda b, s: (0, 0), **w_kwargs),
                ],
                out_specs=(
                    pl.BlockSpec((TB, num_classes), lambda b, s: (b, 0)),
                    pl.BlockSpec((TB, C), lambda b, s: (b, 0)),
                ),
                scratch_shapes=[pltpu.VMEM((TB, C), jnp.float32)],
            ),
            compiler_params=pltpu.CompilerParams(
                dimension_semantics=("parallel", "arbitrary"),
                vmem_limit_bytes=_vmem_limit(1 if single_buffer_weight else 2),
            ),
            cost_estimate=cost,
        )(x3, w_t)

    def _run_pool_only():
        kernel = functools.partial(_pool_kernel, inv_hw=inv_hw, tail_rem=tail_rem)
        pooled = pl.pallas_call(
            kernel,
            out_shape=jax.ShapeDtypeStruct((B, C), dtype),
            grid_spec=pltpu.PrefetchScalarGridSpec(
                num_scalar_prefetch=0,
                grid=(nb, ns),
                in_specs=[pl.BlockSpec((TB, C, TS), lambda b, s: (b, 0, s))],
                out_specs=pl.BlockSpec((TB, C), lambda b, s: (b, 0)),
                scratch_shapes=[pltpu.VMEM((TB, C), jnp.float32)],
            ),
            compiler_params=pltpu.CompilerParams(
                dimension_semantics=("parallel", "arbitrary"),
                vmem_limit_bytes=_vmem_limit(0),
            ),
            cost_estimate=cost,
        )(x3)
        # Large-N fc stays in XLA so the weight never competes with the x block
        # for VMEM (e.g. a 16K x 2048 bf16 weight alone is 64 MiB).
        logits = jnp.dot(pooled.astype(weight.dtype), w_t,
                         preferred_element_type=jnp.float32).astype(dtype)
        return logits, pooled

    if fused:
        try:
            logits, pooled = _run_fused(True)
        except Exception:
            # pl.Buffered(1) is a pure VMEM optimization; fall back to the
            # default double-buffered weight if this JAX/Mosaic rejects it.
            logits, pooled = _run_fused(False)
    else:
        logits, pooled = _run_pool_only()
    return logits, pooled


if __name__ == "__main__":
    key = jax.random.PRNGKey(0)
    kx, kw, kx2, kw2 = jax.random.split(key, 4)

    # Case 1: module-consistent small shapes (B=2, C=32, 16x16, 8 classes).
    B, C, H, W, N = 2, 32, 16, 16, 8
    x = jax.random.normal(kx, (B, C, H, W), dtype=jnp.float32)
    bound = 1.0 / (C ** 0.5)  # mimic nn.Linear default init range
    w = jax.random.uniform(kw, (N, C), dtype=jnp.float32, minval=-bound, maxval=bound)
    logits, pooled = jax.block_until_ready(single_forward(x, w))
    pooled_ref = jnp.mean(x, axis=(2, 3))
    logits_ref = pooled_ref @ w.T
    assert jnp.allclose(pooled, pooled_ref, atol=1e-5, rtol=1e-5)
    assert jnp.allclose(logits, logits_ref, atol=1e-5, rtol=1e-5)

    # Case 2: ragged batch (B=10 -> two batch tiles, last one partial) and 7x7
    # spatial, exercising the no-pad partial-block paths.
    B2, C2, H2, W2, N2 = 10, 16, 7, 7, 8
    x2 = jax.random.normal(kx2, (B2, C2, H2, W2), dtype=jnp.float32)
    bound2 = 1.0 / (C2 ** 0.5)
    w2 = jax.random.uniform(kw2, (N2, C2), dtype=jnp.float32, minval=-bound2, maxval=bound2)
    logits2, pooled2 = jax.block_until_ready(single_forward(x2, w2))
    pooled2_ref = jnp.mean(x2, axis=(2, 3))
    logits2_ref = pooled2_ref @ w2.T
    assert jnp.allclose(pooled2, pooled2_ref, atol=1e-5, rtol=1e-5)
    assert jnp.allclose(logits2, logits2_ref, atol=1e-5, rtol=1e-5)

    # TODO(synk): only global average pooling is implemented; a max-pool `pool`
    # callable would need a different in-kernel reduction (and -inf masking).
    print("KERNEL_OK")
</pallas_src>

<mosaic_0001>
module attributes {stable_mosaic.version = 11 : i64} {
  func.func @_pool_fc_kernel(%arg0: i32, %arg1: i32, %arg2: memref<2x32x256xf32, #tpu.memory_space<vmem>>, %arg3: memref<32x8xf32, #tpu.memory_space<vmem>>, %arg4: memref<2x8xf32, #tpu.memory_space<vmem>>, %arg5: memref<2x32xf32, #tpu.memory_space<vmem>>, %arg6: memref<2x32xf32, #tpu.memory_space<vmem>>) attributes {dimension_semantics = [#tpu.dimension_semantics<parallel>, #tpu.dimension_semantics<arbitrary>], iteration_bounds = array<i64: 1, 1>, scalar_prefetch = 0 : i64, scratch_operands = 1 : i64, tpu.core_type = #tpu.core_type<tc>, window_params = [{transform_indices = @transform_0, window_bounds = array<i64: 2, 32, 256>}, {pipeline_mode = #tpu.pipeline_mode<synchronous>, transform_indices = @transform_1, window_bounds = array<i64: 32, 8>}, {transform_indices = @transform_2, window_bounds = array<i64: 2, 8>}, {transform_indices = @transform_3, window_bounds = array<i64: 2, 32>}]} {
    %c0_i32 = arith.constant 0 : i32
    %0 = arith.cmpi eq, %arg1, %c0_i32 : i32
    %1 = arith.extui %0 : i1 to i32
    %c0_i32_0 = arith.constant 0 : i32
    %2 = arith.cmpi ne, %1, %c0_i32_0 : i32
    scf.if %2 {
      %cst_9 = arith.constant 0.000000e+00 : f32
      %11 = vector.broadcast %cst_9 : f32 to vector<2x32xf32>
      %c0_10 = arith.constant 0 : index
      %c0_11 = arith.constant 0 : index
      %12 = vector.load %arg6[%c0_10, %c0_11] : memref<2x32xf32, #tpu.memory_space<vmem>>, vector<2x32xf32>
      tpu.vector_store %arg6[%c0_10, %c0_11], %11 {strides = array<i32>} : memref<2x32xf32, #tpu.memory_space<vmem>>, vector<2x32xf32>,
    } else {
    }
    %c0 = arith.constant 0 : index
    %c0_1 = arith.constant 0 : index
    %c0_2 = arith.constant 0 : index
    %3 = vector.load %arg2[%c0, %c0_1, %c0_2] : memref<2x32x256xf32, #tpu.memory_space<vmem>>, vector<2x32x256xf32>
    %c0_3 = arith.constant 0 : index
    %c0_4 = arith.constant 0 : index
    %4 = vector.load %arg6[%c0_3, %c0_4] : memref<2x32xf32, #tpu.memory_space<vmem>>, vector<2x32xf32>
    %cst = arith.constant dense<0.000000e+00> : vector<2x32xf32>
    %5 = vector.multi_reduction <add>, %3, %cst [2] : vector<2x32x256xf32> to vector<2x32xf32>
    %6 = arith.addf %4, %5 : vector<2x32xf32>
    %c0_5 = arith.constant 0 : index
    %c0_6 = arith.constant 0 : index
    %7 = vector.load %arg6[%c0_5, %c0_6] : memref<2x32xf32, #tpu.memory_space<vmem>>, vector<2x32xf32>
    tpu.vector_store %arg6[%c0_5, %c0_6], %6 {strides = array<i32>} : memref<2x32xf32, #tpu.memory_space<vmem>>, vector<2x32xf32>,
    %c0_i32_7 = arith.constant 0 : i32
    %8 = arith.cmpi eq, %arg1, %c0_i32_7 : i32
    %9 = arith.extui %8 : i1 to i32
    %c0_i32_8 = arith.constant 0 : i32
    %10 = arith.cmpi ne, %9, %c0_i32_8 : i32
    scf.if %10 {
      %c0_9 = arith.constant 0 : index
      %c0_10 = arith.constant 0 : index
      %11 = vector.load %arg6[%c0_9, %c0_10] : memref<2x32xf32, #tpu.memory_space<vmem>>, vector<2x32xf32>
      %cst_11 = arith.constant 3.906250e-03 : f32
      %12 = vector.broadcast %cst_11 : f32 to vector<2x32xf32>
      %13 = arith.mulf %11, %12 : vector<2x32xf32>
      %c0_12 = arith.constant 0 : index
      %c0_13 = arith.constant 0 : index
      %14 = vector.load %arg5[%c0_12, %c0_13] : memref<2x32xf32, #tpu.memory_space<vmem>>, vector<2x32xf32>
      tpu.vector_store %arg5[%c0_12, %c0_13], %13 {strides = array<i32>} : memref<2x32xf32, #tpu.memory_space<vmem>>, vector<2x32xf32>,
      %c0_14 = arith.constant 0 : index
      %c0_15 = arith.constant 0 : index
      %15 = vector.load %arg3[%c0_14, %c0_15] : memref<32x8xf32, #tpu.memory_space<vmem>>, vector<32x8xf32>
      %cst_16 = arith.constant dense<0.000000e+00> : vector<2x8xf32>
      %16 = tpu.matmul %13, %15, %cst_16 {dimension_numbers = #tpu.dot_dimension_numbers<[1], [0], [0], [1], [0, 0, 1, 1], [], []>} : vector<2x32xf32>, vector<32x8xf32>, vector<2x8xf32> -> vector<2x8xf32>
      %c0_17 = arith.constant 0 : index
      %c0_18 = arith.constant 0 : index
      %17 = vector.load %arg4[%c0_17, %c0_18] : memref<2x8xf32, #tpu.memory_space<vmem>>, vector<2x8xf32>
      tpu.vector_store %arg4[%c0_17, %c0_18], %16 {strides = array<i32>} : memref<2x8xf32, #tpu.memory_space<vmem>>, vector<2x8xf32>,
    } else {
    }
    return
  }
  func.func @transform_0(%arg0: i32, %arg1: i32) -> (i32, i32, i32) {
    %c0_i32 = arith.constant 0 : i32
    %c0_i32_0 = arith.constant 0 : i32
    return %arg0, %c0_i32, %arg1 : i32, i32, i32
  }
  func.func @transform_1(%arg0: i32, %arg1: i32) -> (i32, i32) {
    %c0_i32 = arith.constant 0 : i32
    %c0_i32_0 = arith.constant 0 : i32
    %c0_i32_1 = arith.constant 0 : i32
    return %c0_i32, %c0_i32_0 : i32, i32
  }
  func.func @transform_2(%arg0: i32, %arg1: i32) -> (i32, i32) {
    %c0_i32 = arith.constant 0 : i32
    %c0_i32_0 = arith.constant 0 : i32
    return %arg0, %c0_i32 : i32, i32
  }
  func.func @transform_3(%arg0: i32, %arg1: i32) -> (i32, i32) {
    %c0_i32 = arith.constant 0 : i32
    %c0_i32_0 = arith.constant 0 : i32
    return %arg0, %c0_i32 : i32, i32
  }
}

module attributes {stable_mosaic.version = 11 : i64} {
  func.func @_pool_fc_kernel(%arg0: i32, %arg1: i32, %arg2: memref<2x32x256xf32, #tpu.memory_space<vmem>>, %arg3: memref<32x8xf32, #tpu.memory_space<vmem>>, %arg4: memref<2x8xf32, #tpu.memory_space<vmem>>, %arg5: memref<2x32xf32, #tpu.memory_space<vmem>>, %arg6: memref<2x32xf32, #tpu.memory_space<vmem>>) attributes {dimension_semantics = [#tpu.dimension_semantics<parallel>, #tpu.dimension_semantics<arbitrary>], iteration_bounds = array<i64: 1, 1>, scalar_prefetch = 0 : i64, scratch_operands = 1 : i64, tpu.core_type = #tpu.core_type<tc>, window_params = [{transform_indices = @transform_0, window_bounds = array<i64: 2, 32, 256>}, {pipeline_mode = #tpu.pipeline_mode<synchronous>, transform_indices = @transform_1, window_bounds = array<i64: 32, 8>}, {transform_indices = @transform_2, window_bounds = array<i64: 2, 8>}, {transform_indices = @transform_3, window_bounds = array<i64: 2, 32>}]} {
    %c0_i32 = arith.constant 0 : i32
    %0 = arith.cmpi eq, %arg1, %c0_i32 : i32
    %1 = arith.extui %0 : i1 to i32
    %c0_i32_0 = arith.constant 0 : i32
    %2 = arith.cmpi ne, %1, %c0_i32_0 : i32
    scf.if %2 {
      %cst_9 = arith.constant 0.000000e+00 : f32
      %11 = vector.broadcast %cst_9 : f32 to vector<2x32xf32>
      %c0_10 = arith.constant 0 : index
      %c0_11 = arith.constant 0 : index
      %12 = vector.load %arg6[%c0_10, %c0_11] : memref<2x32xf32, #tpu.memory_space<vmem>>, vector<2x32xf32>
      tpu.vector_store %arg6[%c0_10, %c0_11], %11 {strides = array<i32>} : memref<2x32xf32, #tpu.memory_space<vmem>>, vector<2x32xf32>,
    } else {
    }
    %c0 = arith.constant 0 : index
    %c0_1 = arith.constant 0 : index
    %c0_2 = arith.constant 0 : index
    %3 = vector.load %arg2[%c0, %c0_1, %c0_2] : memref<2x32x256xf32, #tpu.memory_space<vmem>>, vector<2x32x256xf32>
    %c0_3 = arith.constant 0 : index
    %c0_4 = arith.constant 0 : index
    %4 = vector.load %arg6[%c0_3, %c0_4] : memref<2x32xf32, #tpu.memory_space<vmem>>, vector<2x32xf32>
    %cst = arith.constant dense<0.000000e+00> : vector<2x32xf32>
    %5 = vector.multi_reduction <add>, %3, %cst [2] : vector<2x32x256xf32> to vector<2x32xf32>
    %6 = arith.addf %4, %5 : vector<2x32xf32>
    %c0_5 = arith.constant 0 : index
    %c0_6 = arith.constant 0 : index
    %7 = vector.load %arg6[%c0_5, %c0_6] : memref<2x32xf32, #tpu.memory_space<vmem>>, vector<2x32xf32>
    tpu.vector_store %arg6[%c0_5, %c0_6], %6 {strides = array<i32>} : memref<2x32xf32, #tpu.memory_space<vmem>>, vector<2x32xf32>,
    %c0_i32_7 = arith.constant 0 : i32
    %8 = arith.cmpi eq, %arg1, %c0_i32_7 : i32
    %9 = arith.extui %8 : i1 to i32
    %c0_i32_8 = arith.constant 0 : i32
    %10 = arith.cmpi ne, %9, %c0_i32_8 : i32
    scf.if %10 {
      %c0_9 = arith.constant 0 : index
      %c0_10 = arith.constant 0 : index
      %11 = vector.load %arg6[%c0_9, %c0_10] : memref<2x32xf32, #tpu.memory_space<vmem>>, vector<2x32xf32>
      %cst_11 = arith.constant 3.906250e-03 : f32
      %12 = vector.broadcast %cst_11 : f32 to vector<2x32xf32>
      %13 = arith.mulf %11, %12 : vector<2x32xf32>
      %c0_12 = arith.constant 0 : index
      %c0_13 = arith.constant 0 : index
      %14 = vector.load %arg5[%c0_12, %c0_13] : memref<2x32xf32, #tpu.memory_space<vmem>>, vector<2x32xf32>
      tpu.vector_store %arg5[%c0_12, %c0_13], %13 {strides = array<i32>} : memref<2x32xf32, #tpu.memory_space<vmem>>, vector<2x32xf32>,
      %c0_14 = arith.constant 0 : index
      %c0_15 = arith.constant 0 : index
      %15 = vector.load %arg3[%c0_14, %c0_15] : memref<32x8xf32, #tpu.memory_space<vmem>>, vector<32x8xf32>
      %cst_16 = arith.constant dense<0.000000e+00> : vector<2x8xf32>
      %16 = tpu.matmul %13, %15, %cst_16 {dimension_numbers = #tpu.dot_dimension_numbers<[1], [0], [0], [1], [0, 0, 1, 1], [], []>} : vector<2x32xf32>, vector<32x8xf32>, vector<2x8xf32> -> vector<2x8xf32>
      %c0_17 = arith.constant 0 : index
      %c0_18 = arith.constant 0 : index
      %17 = vector.load %arg4[%c0_17, %c0_18] : memref<2x8xf32, #tpu.memory_space<vmem>>, vector<2x8xf32>
      tpu.vector_store %arg4[%c0_17, %c0_18], %16 {strides = array<i32>} : memref<2x8xf32, #tpu.memory_space<vmem>>, vector<2x8xf32>,
    } else {
    }
    return
  }
  func.func @transform_0(%arg0: i32, %arg1: i32) -> (i32, i32, i32) {
    %c0_i32 = arith.constant 0 : i32
    %c0_i32_0 = arith.constant 0 : i32
    return %arg0, %c0_i32, %arg1 : i32, i32, i32
  }
  func.func @transform_1(%arg0: i32, %arg1: i32) -> (i32, i32) {
    %c0_i32 = arith.constant 0 : i32
    %c0_i32_0 = arith.constant 0 : i32
    %c0_i32_1 = arith.constant 0 : i32
    return %c0_i32, %c0_i32_0 : i32, i32
  }
  func.func @transform_2(%arg0: i32, %arg1: i32) -> (i32, i32) {
    %c0_i32 = arith.constant 0 : i32
    %c0_i32_0 = arith.constant 0 : i32
    return %arg0, %c0_i32 : i32, i32
  }
  func.func @transform_3(%arg0: i32, %arg1: i32) -> (i32, i32) {
    %c0_i32 = arith.constant 0 : i32
    %c0_i32_0 = arith.constant 0 : i32
    return %arg0, %c0_i32 : i32, i32
  }
}

</mosaic_0001>

<bundles_post_ra>
// kernel: tpu_custom_call.1
= control target key start
LH: loop header
LB: loop body
LE: loop exit
PB: predicated region body
PF: predicated region fallthrough
CT: control target
= control target key end

     0   :  { %9 = vsyncpa [#allocation4], 0  ;;  %s392_s0 = inlined_call_operand.hbm [shape: f32[2,32,256], index: 0, kind: input, shape index: {}]   ;;  %s393_s1 = inlined_call_operand.vmem [shape: f32[32,8], index: 1, kind: input, shape index: {}]   ;;  %s394_s2 = inlined_call_operand.hbm [shape: f32[2,8], index: 2, kind: output, shape index: {0}]   ;;  %s395_s3 = inlined_call_operand.hbm [shape: f32[2,32], index: 3, kind: output, shape index: {1}]  }
   0x1   :  { %10 = vsyncpa [#allocation5], 0 }
   0x2   :  { %11 = vsyncpa [#allocation8], 0  ;;  %s341_s12 = smov [#allocation3]  }
   0x3   :  { %s17_s13 = sshll.u32 %s341_s12, 4  ;;  %s18_s13 = int_to_ptr.vmem [resolvable:$true] %s17_s13 }
   0x4   :  { %s283_s14 = scalar_lea.vmem %s18_s13, 2048  ;;  %p288_p1 = scmp.lt.s32.totalorder %s18_s13, %s18_s13 }
   0x5   :  { %p284_p0 = scmp.ne.s32.totalorder %s18_s13, %s283_s14  ;;  %p289_p2 = scmp.lt.s32.totalorder %s283_s14, %s283_s14 }
   0x7   :  { %p290_p3 = por %p289_p2, %p288_p1 }
   0x9   :  { %p291_p4 = pnand %p290_p3, %p284_p0 }
   0xb   :  { %294 = shalt.err (!%p291_p4)
}
   0xc   :  { %s342_s15 = smov 256   ;;  %s343_s16 = smov 16  }
   0xd   :  { %23 = dma.hbm_to_vmem [thread:$0]  %s392_s0, 2048, %s18_s13, [#allocation4], %s342_s15, %s342_s15, %s343_s16  }
   0xe   :  { %335 = dma.done.wait [#allocation4], 2048  }
   0xf   :  { %336 = vsyncadd [#allocation4], 4294965248  ;;  %v43_v0 = vld [vmem:[#allocation3 + $0x40] sm:$0xff]  ;;  %v44_v1 = vld [vmem:[#allocation3 + $0x48] sm:$0xff]  ;;  %vm33_vm0 = vcmask 254976   ;;  %v344_v24 = vmov 0.0   ;;  %v84_v29 = vlaneseq }
  0x10   :  { %v35_v2 = vld [vmem:[#allocation3] sm:$0xff]  ;;  %v64_v3 = vadd.f32 %v44_v1, %v43_v0  ;;  %v36_v4 = vld [vmem:[#allocation3 + $0x8] sm:$0xff]  ;;  %v45_v5 = vld [vmem:[#allocation3 + $0x50] sm:$0xff]  ;;  %34 = vst.msk [vmem:[#allocation2] sm:$0x3] %vm33_vm0, %v344_v24  ;;  %257 = vmatprep.subr.mxu0 %v344_v24  ;;  %vm345_vm1 = vmmov 0  }
  0x11   :  { %v46_v6 = vld [vmem:[#allocation3 + $0x58] sm:$0xff]  ;;  %v52_v7 = vadd.f32 %v36_v4, %v35_v2  ;;  %v37_v8 = vld [vmem:[#allocation3 + $0x10] sm:$0xff]  ;;  %v47_v12 = vld [vmem:[#allocation3 + $0x60] sm:$0xff]  ;;  %265 = vmatprep.mubr.msk.f32.mxu0 %vm345_vm1, %v344_v24  ;;  %v85_v30 = vand.u32 127, %v84_v29  ;;  %v87_v35 = vshrl.u32 %v84_v29, 7  ;;  %vm95_vm2 = vcmask 130112  }
  0x12   :  { %v38_v9 = vld [vmem:[#allocation3 + $0x18] sm:$0xff]  ;;  %65 = vadd.xlane.f32.xlu1 %v64_v3  ;;  %v67_v10 = vadd.f32 %v46_v6, %v45_v5  ;;  %v48_v13 = vld [vmem:[#allocation3 + $0x68] sm:$0xff]  ;;  %v39_v14 = vld [vmem:[#allocation3 + $0x20] sm:$0xff]  ;;  %vm102_vm3 = vcmask 195712   ;;  %vm109_vm4 = vcmask 261312   ;;  %vm130_vm5 = vcmask 1041409  }
  0x13   :  { %53 = vadd.xlane.f32.xlu0 %v52_v7  ;;  %v55_v11 = vadd.f32 %v38_v9, %v37_v8  ;;  %v40_v15 = vld [vmem:[#allocation3 + $0x28] sm:$0xff]  ;;  %v70_v16 = vadd.f32 %v48_v13, %v47_v12  ;;  %v49_v18 = vld [vmem:[#allocation3 + $0x70] sm:$0xff]  ;;  %v50_v19 = vld [vmem:[#allocation3 + $0x78] sm:$0xff]  ;;  %v90_v33 = vadd.s32 4294967288, %v85_v30  ;;  %v97_v34 = vadd.s32 4294967280, %v85_v30 }
  0x14   :  { %v58_v17 = vadd.f32 %v40_v15, %v39_v14  ;;  %v41_v20 = vld [vmem:[#allocation3 + $0x30] sm:$0xff]  ;;  %v42_v21 = vld [vmem:[#allocation3 + $0x38] sm:$0xff]  ;;  %v73_v22 = vadd.f32 %v50_v19, %v49_v18  ;;  %v143_v27 = vld [vmem:[%s393_s1 + $0x8] sm:$0xff]  ;;  %v104_v39 = vadd.s32 4294967272, %v85_v30  ;;  %v88_v41 = vsub.s32 %v85_v30, %v87_v35 }
  0x15   :  { %v61_v23 = vadd.f32 %v42_v21, %v41_v20  ;;  %v145_v25 = vld [vmem:[%s393_s1 + $0x18] sm:$0xff]  ;;  %v144_v26 = vld [vmem:[%s393_s1 + $0x10] sm:$0xff]  ;;  %v142_v28 = vld [vmem:[%s393_s1] sm:$0xff]  ;;  %v93_v37 = vsub.s32 %v90_v33, %v87_v35  ;;  %v100_v40 = vsub.s32 %v97_v34, %v87_v35  ;;  %vm146_vm6 = vcmask 261120   ;;  %s346_s1 = smov [#allocation7]  }
  0x16   :  { %68 = vadd.xlane.f32.xlu1 %v67_v10  ;;  %258 = vmatpush3.msra.mxu0 %v145_v25  ;;  %v107_v45 = vsub.s32 %v104_v39, %v87_v35  ;;  %s238_s26 = sshll.u32 %s346_s1, 4  ;;  %s239_s26 = int_to_ptr.vmem [resolvable:$true] %s238_s26 }
  0x17   :  { %56 = vadd.xlane.f32.xlu0 %v55_v11  ;;  %259 = vmatprep.subr.mxu0 %v344_v24  ;;  %v51_v60 = vld [vmem:[#allocation2] sm:$0x3]  ;;  %s295_s27 = scalar_lea.vmem %s239_s26, 32  ;;  %p300_p6 = scmp.lt.s32.totalorder %s239_s26, %s239_s26 }
  0x18   :  { %260 = vmatpush3.msra.mxu0 %v144_v26  ;;  %p296_p5 = scmp.ne.s32.totalorder %s239_s26, %s295_s27  ;;  %p301_p7 = scmp.lt.s32.totalorder %s295_s27, %s295_s27 }
  0x19   :  { %261 = vmatprep.subr.mxu0 %v344_v24 }
  0x1a   :  { %71 = vadd.xlane.f32.xlu1 %v70_v16  ;;  %262 = vmatpush3.msra.mxu0 %v143_v27  ;;  %p302_p8 = por %p301_p7, %p300_p6 }
  0x1b   :  { %59 = vadd.xlane.f32.xlu0 %v58_v17  ;;  %263 = vmatprep.subr.mxu0 %v344_v24 }
  0x1c   :  { %264 = vmatpush3.msra.mxu0 %v142_v28  ;;  %p303_p9 = pnand %p302_p8, %p296_p5 }
  0x1e   :  { %74 = vadd.xlane.f32.xlu1 %v73_v22 }
  0x1f   :  { %62 = vadd.xlane.f32.xlu0 %v61_v23 }
  0x9b   :  { %v66_v31 = vpop.xlane.xlu1 %65 }
  0x9c   :  { %v54_v32 = vpop.xlane.xlu0 %53  ;;  %v114_v48 = vrot.slane %v66_v31, %v88_v41 }
  0x9d   :  { %v89_v50 = vrot.slane %v54_v32, %v88_v41 }
  0x9f   :  { %v69_v36 = vpop.xlane.xlu1 %68 }
  0xa0   :  { %v57_v38 = vpop.xlane.xlu0 %56  ;;  %v118_v43 = vrot.slane %v69_v36, %v93_v37 }
  0xa1   :  { %v94_v46 = vrot.slane %v57_v38, %v93_v37 }
  0xa2   :  { %v119_v52 = vsel %vm95_vm2, %v118_v43, %v114_v48 }
  0xa3   :  { %v72_v42 = vpop.xlane.xlu1 %71  ;;  %v96_v55 = vsel %vm95_vm2, %v94_v46, %v89_v50 }
  0xa4   :  { %v60_v44 = vpop.xlane.xlu0 %59  ;;  %v123_v47 = vrot.slane %v72_v42, %v100_v40 }
  0xa5   :  { %v101_v49 = vrot.slane %v60_v44, %v100_v40 }
  0xa6   :  { %v124_v56 = vsel %vm102_vm3, %v123_v47, %v119_v52 }
  0xa7   :  { %v75_v51 = vpop.xlane.xlu1 %74  ;;  %v103_v58 = vsel %vm102_vm3, %v101_v49, %v96_v55 }
  0xa8   :  { %v128_v53 = vrot.slane %v75_v51, %v107_v45  ;;  %v63_v54 = vpop.xlane.xlu0 %62 }
  0xa9   :  { %v108_v57 = vrot.slane %v63_v54, %v107_v45 }
  0xaa   :  { %v129_v59 = vsel %vm109_vm4, %v128_v53, %v124_v56 }
  0xab   :  { %v110_v61 = vsel %vm109_vm4, %v108_v57, %v103_v58 }
  0xac   :  { %v131_v62 = vsel %vm130_vm5, %v129_v59, %v110_v61 }
  0xad   :  { %v133_v63 = vadd.f32 %v131_v62, %v51_v60 }
  0xaf   :  { %135 = vst.msk [vmem:[#allocation2] sm:$0x3] %vm33_vm0, %v133_v63 }
  0xb6   :  { %v139_v0 = vld [vmem:[#allocation2] sm:$0x3] }
  0xb7   :  { %v140_v1 = vmul.f32 0.00390625, %v139_v0 }
  0xb9   :  { %266 = vmatmul.mubr.msk.f32.vlgmr.msra.gmra.mxu0 %vm146_vm6, %v140_v1  ;;  %141 = vst.msk [vmem:[#allocation7] sm:$0x3] %vm33_vm0, %v140_v1 }
  0xba   :  { %306 = shalt.err (!%p303_p9)
}
  0xbb   :  { %241 = dma.vmem_to_hbm [thread:$0]  %s239_s26, 32, %s395_s3, [#allocation8]   ;;  %vm220_vm7 = vcmask 58368  }
  0xbc   :  { %s347_s30 = smov [#allocation6]  }
  0xbd   :  { %s228_s4 = sshll.u32 %s347_s30, 4  ;;  %s229_s4 = int_to_ptr.vmem [resolvable:$true] %s228_s4 }
  0xbe   :  { %s315_s5 = scalar_lea.vmem %s229_s4, 32  ;;  %p320_p11 = scmp.lt.s32.totalorder %s229_s4, %s229_s4 }
  0xbf   :  { %p316_p10 = scmp.ne.s32.totalorder %s229_s4, %s315_s5  ;;  %p321_p12 = scmp.lt.s32.totalorder %s315_s5, %s315_s5 }
  0xc1   :  { %p322_p13 = por %p321_p12, %p320_p11 }
  0xc3   :  { %p323_p0 = pnand %p322_p13, %p316_p10 }
 0x179   :  { %v216_v2 = vpop.f32.mrf.mxu0 }
 0x17a   :  { %221 = vst.msk [vmem:[#allocation6] sm:$0x3] %vm220_vm7, %v216_v2 }
 0x17b   :  { %v267_v3 = vpop.f32.mrf.mxu0 }
 0x17c   :  { %326 = shalt.err (!%p323_p0)
}
 0x17d   :  { %231 = dma.vmem_to_hbm [thread:$0]  %s229_s4, 32, %s394_s2, [#allocation5]  }
 0x17e   :  { %337 = dma.done.wait [#allocation5], 32  }
 0x17f   :  { %338 = vsyncadd [#allocation5], 4294967264 }
 0x180   :  { %339 = dma.done.wait [#allocation8], 32  }
 0x181   :  { %340 = vsyncadd [#allocation8], 4294967264 }
 0x182   :  { %248 = vsyncpa [#allocation4], 1 }
 0x183   :  { %249 = vsyncpa [#allocation5], 1 }
 0x184   :  { %250 = vsyncpa [#allocation8], 1 }

// kernel: tpu_custom_call.1
= control target key start
LH: loop header
LB: loop body
LE: loop exit
PB: predicated region body
PF: predicated region fallthrough
CT: control target
= control target key end

     0   :  { %9 = vsyncpa [#allocation4], 0  ;;  %s392_s0 = inlined_call_operand.hbm [shape: f32[2,32,256], index: 0, kind: input, shape index: {}]   ;;  %s393_s1 = inlined_call_operand.vmem [shape: f32[32,8], index: 1, kind: input, shape index: {}]   ;;  %s394_s2 = inlined_call_operand.hbm [shape: f32[2,8], index: 2, kind: output, shape index: {0}]   ;;  %s395_s3 = inlined_call_operand.hbm [shape: f32[2,32], index: 3, kind: output, shape index: {1}]  }
   0x1   :  { %10 = vsyncpa [#allocation5], 0 }
   0x2   :  { %11 = vsyncpa [#allocation8], 0  ;;  %s341_s12 = smov [#allocation3]  }
   0x3   :  { %s17_s13 = sshll.u32 %s341_s12, 4  ;;  %s18_s13 = int_to_ptr.vmem [resolvable:$true] %s17_s13 }
   0x4   :  { %s283_s14 = scalar_lea.vmem %s18_s13, 2048  ;;  %p288_p1 = scmp.lt.s32.totalorder %s18_s13, %s18_s13 }
   0x5   :  { %p284_p0 = scmp.ne.s32.totalorder %s18_s13, %s283_s14  ;;  %p289_p2 = scmp.lt.s32.totalorder %s283_s14, %s283_s14 }
   0x7   :  { %p290_p3 = por %p289_p2, %p288_p1 }
   0x9   :  { %p291_p4 = pnand %p290_p3, %p284_p0 }
   0xb   :  { %294 = shalt.err (!%p291_p4)
}
   0xc   :  { %s342_s15 = smov 256   ;;  %s343_s16 = smov 16  }
   0xd   :  { %23 = dma.hbm_to_vmem [thread:$0]  %s392_s0, 2048, %s18_s13, [#allocation4], %s342_s15, %s342_s15, %s343_s16  }
   0xe   :  { %335 = dma.done.wait [#allocation4], 2048  }
   0xf   :  { %336 = vsyncadd [#allocation4], 4294965248  ;;  %v43_v0 = vld [vmem:[#allocation3 + $0x40] sm:$0xff]  ;;  %v44_v1 = vld [vmem:[#allocation3 + $0x48] sm:$0xff]  ;;  %vm33_vm0 = vcmask 254976   ;;  %v344_v24 = vmov 0.0   ;;  %v84_v29 = vlaneseq }
  0x10   :  { %v35_v2 = vld [vmem:[#allocation3] sm:$0xff]  ;;  %v64_v3 = vadd.f32 %v44_v1, %v43_v0  ;;  %v36_v4 = vld [vmem:[#allocation3 + $0x8] sm:$0xff]  ;;  %v45_v5 = vld [vmem:[#allocation3 + $0x50] sm:$0xff]  ;;  %34 = vst.msk [vmem:[#allocation2] sm:$0x3] %vm33_vm0, %v344_v24  ;;  %257 = vmatprep.subr.mxu0 %v344_v24  ;;  %vm345_vm1 = vmmov 0  }
  0x11   :  { %v46_v6 = vld [vmem:[#allocation3 + $0x58] sm:$0xff]  ;;  %v52_v7 = vadd.f32 %v36_v4, %v35_v2  ;;  %v37_v8 = vld [vmem:[#allocation3 + $0x10] sm:$0xff]  ;;  %v47_v12 = vld [vmem:[#allocation3 + $0x60] sm:$0xff]  ;;  %265 = vmatprep.mubr.msk.f32.mxu0 %vm345_vm1, %v344_v24  ;;  %v85_v30 = vand.u32 127, %v84_v29  ;;  %v87_v35 = vshrl.u32 %v84_v29, 7  ;;  %vm95_vm2 = vcmask 130112  }
  0x12   :  { %v38_v9 = vld [vmem:[#allocation3 + $0x18] sm:$0xff]  ;;  %65 = vadd.xlane.f32.xlu1 %v64_v3  ;;  %v67_v10 = vadd.f32 %v46_v6, %v45_v5  ;;  %v48_v13 = vld [vmem:[#allocation3 + $0x68] sm:$0xff]  ;;  %v39_v14 = vld [vmem:[#allocation3 + $0x20] sm:$0xff]  ;;  %vm102_vm3 = vcmask 195712   ;;  %vm109_vm4 = vcmask 261312   ;;  %vm130_vm5 = vcmask 1041409  }
  0x13   :  { %53 = vadd.xlane.f32.xlu0 %v52_v7  ;;  %v55_v11 = vadd.f32 %v38_v9, %v37_v8  ;;  %v40_v15 = vld [vmem:[#allocation3 + $0x28] sm:$0xff]  ;;  %v70_v16 = vadd.f32 %v48_v13, %v47_v12  ;;  %v49_v18 = vld [vmem:[#allocation3 + $0x70] sm:$0xff]  ;;  %v50_v19 = vld [vmem:[#allocation3 + $0x78] sm:$0xff]  ;;  %v90_v33 = vadd.s32 4294967288, %v85_v30  ;;  %v97_v34 = vadd.s32 4294967280, %v85_v30 }
  0x14   :  { %v58_v17 = vadd.f32 %v40_v15, %v39_v14  ;;  %v41_v20 = vld [vmem:[#allocation3 + $0x30] sm:$0xff]  ;;  %v42_v21 = vld [vmem:[#allocation3 + $0x38] sm:$0xff]  ;;  %v73_v22 = vadd.f32 %v50_v19, %v49_v18  ;;  %v143_v27 = vld [vmem:[%s393_s1 + $0x8] sm:$0xff]  ;;  %v104_v39 = vadd.s32 4294967272, %v85_v30  ;;  %v88_v41 = vsub.s32 %v85_v30, %v87_v35 }
  0x15   :  { %v61_v23 = vadd.f32 %v42_v21, %v41_v20  ;;  %v145_v25 = vld [vmem:[%s393_s1 + $0x18] sm:$0xff]  ;;  %v144_v26 = vld [vmem:[%s393_s1 + $0x10] sm:$0xff]  ;;  %v142_v28 = vld [vmem:[%s393_s1] sm:$0xff]  ;;  %v93_v37 = vsub.s32 %v90_v33, %v87_v35  ;;  %v100_v40 = vsub.s32 %v97_v34, %v87_v35  ;;  %vm146_vm6 = vcmask 261120   ;;  %s346_s1 = smov [#allocation7]  }
  0x16   :  { %68 = vadd.xlane.f32.xlu1 %v67_v10  ;;  %258 = vmatpush3.msra.mxu0 %v145_v25  ;;  %v107_v45 = vsub.s32 %v104_v39, %v87_v35  ;;  %s238_s26 = sshll.u32 %s346_s1, 4  ;;  %s239_s26 = int_to_ptr.vmem [resolvable:$true] %s238_s26 }
  0x17   :  { %56 = vadd.xlane.f32.xlu0 %v55_v11  ;;  %259 = vmatprep.subr.mxu0 %v344_v24  ;;  %v51_v60 = vld [vmem:[#allocation2] sm:$0x3]  ;;  %s295_s27 = scalar_lea.vmem %s239_s26, 32  ;;  %p300_p6 = scmp.lt.s32.totalorder %s239_s26, %s239_s26 }
  0x18   :  { %260 = vmatpush3.msra.mxu0 %v144_v26  ;;  %p296_p5 = scmp.ne.s32.totalorder %s239_s26, %s295_s27  ;;  %p301_p7 = scmp.lt.s32.totalorder %s295_s27, %s295_s27 }
  0x19   :  { %261 = vmatprep.subr.mxu0 %v344_v24 }
  0x1a   :  { %71 = vadd.xlane.f32.xlu1 %v70_v16  ;;  %262 = vmatpush3.msra.mxu0 %v143_v27  ;;  %p302_p8 = por %p301_p7, %p300_p6 }
  0x1b   :  { %59 = vadd.xlane.f32.xlu0 %v58_v17  ;;  %263 = vmatprep.subr.mxu0 %v344_v24 }
  0x1c   :  { %264 = vmatpush3.msra.mxu0 %v142_v28  ;;  %p303_p9 = pnand %p302_p8, %p296_p5 }
  0x1e   :  { %74 = vadd.xlane.f32.xlu1 %v73_v22 }
  0x1f   :  { %62 = vadd.xlane.f32.xlu0 %v61_v23 }
  0x9b   :  { %v66_v31 = vpop.xlane.xlu1 %65 }
  0x9c   :  { %v54_v32 = vpop.xlane.xlu0 %53  ;;  %v114_v48 = vrot.slane %v66_v31, %v88_v41 }
  0x9d   :  { %v89_v50 = vrot.slane %v54_v32, %v88_v41 }
  0x9f   :  { %v69_v36 = vpop.xlane.xlu1 %68 }
  0xa0   :  { %v57_v38 = vpop.xlane.xlu0 %56  ;;  %v118_v43 = vrot.slane %v69_v36, %v93_v37 }
  0xa1   :  { %v94_v46 = vrot.slane %v57_v38, %v93_v37 }
  0xa2   :  { %v119_v52 = vsel %vm95_vm2, %v118_v43, %v114_v48 }
  0xa3   :  { %v72_v42 = vpop.xlane.xlu1 %71  ;;  %v96_v55 = vsel %vm95_vm2, %v94_v46, %v89_v50 }
  0xa4   :  { %v60_v44 = vpop.xlane.xlu0 %59  ;;  %v123_v47 = vrot.slane %v72_v42, %v100_v40 }
  0xa5   :  { %v101_v49 = vrot.slane %v60_v44, %v100_v40 }
  0xa6   :  { %v124_v56 = vsel %vm102_vm3, %v123_v47, %v119_v52 }
  0xa7   :  { %v75_v51 = vpop.xlane.xlu1 %74  ;;  %v103_v58 = vsel %vm102_vm3, %v101_v49, %v96_v55 }
  0xa8   :  { %v128_v53 = vrot.slane %v75_v51, %v107_v45  ;;  %v63_v54 = vpop.xlane.xlu0 %62 }
  0xa9   :  { %v108_v57 = vrot.slane %v63_v54, %v107_v45 }
  0xaa   :  { %v129_v59 = vsel %vm109_vm4, %v128_v53, %v124_v56 }
  0xab   :  { %v110_v61 = vsel %vm109_vm4, %v108_v57, %v103_v58 }
  0xac   :  { %v131_v62 = vsel %vm130_vm5, %v129_v59, %v110_v61 }
  0xad   :  { %v133_v63 = vadd.f32 %v131_v62, %v51_v60 }
  0xaf   :  { %135 = vst.msk [vmem:[#allocation2] sm:$0x3] %vm33_vm0, %v133_v63 }
  0xb6   :  { %v139_v0 = vld [vmem:[#allocation2] sm:$0x3] }
  0xb7   :  { %v140_v1 = vmul.f32 0.00390625, %v139_v0 }
  0xb9   :  { %266 = vmatmul.mubr.msk.f32.vlgmr.msra.gmra.mxu0 %vm146_vm6, %v140_v1  ;;  %141 = vst.msk [vmem:[#allocation7] sm:$0x3] %vm33_vm0, %v140_v1 }
  0xba   :  { %306 = shalt.err (!%p303_p9)
}
  0xbb   :  { %241 = dma.vmem_to_hbm [thread:$0]  %s239_s26, 32, %s395_s3, [#allocation8]   ;;  %vm220_vm7 = vcmask 58368  }
  0xbc   :  { %s347_s30 = smov [#allocation6]  }
  0xbd   :  { %s228_s4 = sshll.u32 %s347_s30, 4  ;;  %s229_s4 = int_to_ptr.vmem [resolvable:$true] %s228_s4 }
  0xbe   :  { %s315_s5 = scalar_lea.vmem %s229_s4, 32  ;;  %p320_p11 = scmp.lt.s32.totalorder %s229_s4, %s229_s4 }
  0xbf   :  { %p316_p10 = scmp.ne.s32.totalorder %s229_s4, %s315_s5  ;;  %p321_p12 = scmp.lt.s32.totalorder %s315_s5, %s315_s5 }
  0xc1   :  { %p322_p13 = por %p321_p12, %p320_p11 }
  0xc3   :  { %p323_p0 = pnand %p322_p13, %p316_p10 }
 0x179   :  { %v216_v2 = vpop.f32.mrf.mxu0 }
 0x17a   :  { %221 = vst.msk [vmem:[#allocation6] sm:$0x3] %vm220_vm7, %v216_v2 }
 0x17b   :  { %v267_v3 = vpop.f32.mrf.mxu0 }
 0x17c   :  { %326 = shalt.err (!%p323_p0)
}
 0x17d   :  { %231 = dma.vmem_to_hbm [thread:$0]  %s229_s4, 32, %s394_s2, [#allocation5]  }
 0x17e   :  { %337 = dma.done.wait [#allocation5], 32  }
 0x17f   :  { %338 = vsyncadd [#allocation5], 4294967264 }
 0x180   :  { %339 = dma.done.wait [#allocation8], 32  }
 0x181   :  { %340 = vsyncadd [#allocation8], 4294967264 }
 0x182   :  { %248 = vsyncpa [#allocation4], 1 }
 0x183   :  { %249 = vsyncpa [#allocation5], 1 }
 0x184   :  { %250 = vsyncpa [#allocation8], 1 }

</bundles_post_ra>
